<compile_context>
chip_gen: v7x
topology: tpu7x:2x2x1
jax: 0.10.0
libtpu: 0.0.40
codegen_flags: <defaults>
</compile_context>

<pallas_src>
import jax
import jax.numpy as jnp
from jax.experimental import pallas as pl
from jax.experimental.pallas import tpu as pltpu


def _multiply_kernel(a_ref, b_ref, c_ref, o_ref):
    # Elementwise hot path: runs entirely in VMEM on the VPU.
    o_ref[...] = a_ref[...] * b_ref[...] * c_ref[...]


_LANES = 128
# If 3 inputs + 1 output total at most this many bytes, skip tiling entirely.
_SMALL_TOTAL_BYTES = 2 * 1024 * 1024


def _sublane_multiple(dtype):
    # Sub-32-bit dtypes pack along sublanes: f32 -> 8 rows, bf16 -> 16, int8 -> 32.
    itemsize = jnp.dtype(dtype).itemsize
    return max(8, 32 // max(itemsize, 1))


def my_multiply(a, b, c, *, tile_rows=1024):
    assert a.shape == b.shape == c.shape
    assert a.dtype == b.dtype == c.dtype

    itemsize = jnp.dtype(a.dtype).itemsize
    total_bytes = 4 * a.size * itemsize  # 3 inputs + 1 output

    # ---------- small path: single full-array block, original layout ----------
    if total_bytes <= _SMALL_TOTAL_BYTES:
        return pl.pallas_call(
            _multiply_kernel,
            out_shape=jax.ShapeDtypeStruct(a.shape, a.dtype),
        )(a, b, c)

    # ---------- large path: lane-dense (rows, 128) slab, row-tiled grid ----------
    orig_shape = a.shape
    total = a.size
    rows = pl.cdiv(total, _LANES)

    # Bound the row tile and round it to the dtype's sublane packing.
    # VMEM at tr=1024 / f32: 4 arrays x 2 buffers x 1024 x 128 x 4 B = 4 MiB,
    # well under the scoped limit on v5e (16 MiB) and v6e/v7x (32 MiB).
    sub = _sublane_multiple(a.dtype)
    tr = max(sub, (tile_rows // sub) * sub)

    if rows <= tr:
        tr_eff = rows            # single bounded block
        rows_padded = rows
    else:
        tr_eff = tr
        rows_padded = pl.cdiv(rows, tr) * tr   # pad rows; never collapse to one giant block

    pad = rows_padded * _LANES - total

    def to_slab(x):
        x = x.reshape(-1)
        if pad:
            x = jnp.pad(x, (0, pad))
        return x.reshape(rows_padded, _LANES)

    a2, b2, c2 = to_slab(a), to_slab(b), to_slab(c)

    grid = (rows_padded // tr_eff,)
    spec = pl.BlockSpec((tr_eff, _LANES), lambda i: (i, 0))

    out2 = pl.pallas_call(
        _multiply_kernel,
        out_shape=jax.ShapeDtypeStruct((rows_padded, _LANES), a.dtype),
        grid_spec=pltpu.PrefetchScalarGridSpec(
            num_scalar_prefetch=0,
            grid=grid,
            in_specs=[spec, spec, spec],
            out_specs=spec,
        ),
        compiler_params=pltpu.CompilerParams(
            dimension_semantics=("parallel",),  # lets v7x shard across both TCs
        ),
    )(a2, b2, c2)

    out = out2.reshape(-1)
    if pad:
        out = out[:total]
    return out.reshape(orig_shape)


if __name__ == "__main__":
    key = jax.random.PRNGKey(0)

    # Small path (matches the module's toy NCHW shape).
    ka, kb, kc, kd, ke, kf = jax.random.split(key, 6)
    shape = (2, 4, 16, 16)
    a = jax.random.normal(ka, shape, dtype=jnp.float32)
    b = jax.random.normal(kb, shape, dtype=jnp.float32)
    c = jax.random.normal(kc, shape, dtype=jnp.float32)

    out = my_multiply(a, b, c)
    jax.block_until_ready(out)
    ref = a * b * c
    assert out.shape == ref.shape and out.dtype == ref.dtype
    assert jnp.allclose(out, ref, rtol=1e-6, atol=1e-6)

    # Large path (exercises the tiled, parallel-grid pipeline).
    big_shape = (512, 1024)
    ab = jax.random.normal(kd, big_shape, dtype=jnp.float32)
    bb = jax.random.normal(ke, big_shape, dtype=jnp.float32)
    cb = jax.random.normal(kf, big_shape, dtype=jnp.float32)

    out_big = my_multiply(ab, bb, cb)
    jax.block_until_ready(out_big)
    ref_big = ab * bb * cb
    assert out_big.shape == ref_big.shape and out_big.dtype == ref_big.dtype
    assert jnp.allclose(out_big, ref_big, rtol=1e-6, atol=1e-6)

    print("KERNEL_OK")
</pallas_src>

<mosaic_0001>
module attributes {stable_mosaic.version = 11 : i64} {
  func.func @_multiply_kernel(%arg0: memref<2x4x16x16xf32, #tpu.memory_space<vmem>>, %arg1: memref<2x4x16x16xf32, #tpu.memory_space<vmem>>, %arg2: memref<2x4x16x16xf32, #tpu.memory_space<vmem>>, %arg3: memref<2x4x16x16xf32, #tpu.memory_space<vmem>>) attributes {dimension_semantics = [], scalar_prefetch = 0 : i64, scratch_operands = 0 : i64, tpu.core_type = #tpu.core_type<tc>} {
    %c0 = arith.constant 0 : index
    %c0_0 = arith.constant 0 : index
    %c0_1 = arith.constant 0 : index
    %c0_2 = arith.constant 0 : index
    %0 = vector.load %arg0[%c0, %c0_0, %c0_1, %c0_2] : memref<2x4x16x16xf32, #tpu.memory_space<vmem>>, vector<2x4x16x16xf32>
    %c0_3 = arith.constant 0 : index
    %c0_4 = arith.constant 0 : index
    %c0_5 = arith.constant 0 : index
    %c0_6 = arith.constant 0 : index
    %1 = vector.load %arg1[%c0_3, %c0_4, %c0_5, %c0_6] : memref<2x4x16x16xf32, #tpu.memory_space<vmem>>, vector<2x4x16x16xf32>
    %2 = arith.mulf %0, %1 : vector<2x4x16x16xf32>
    %c0_7 = arith.constant 0 : index
    %c0_8 = arith.constant 0 : index
    %c0_9 = arith.constant 0 : index
    %c0_10 = arith.constant 0 : index
    %3 = vector.load %arg2[%c0_7, %c0_8, %c0_9, %c0_10] : memref<2x4x16x16xf32, #tpu.memory_space<vmem>>, vector<2x4x16x16xf32>
    %4 = arith.mulf %2, %3 : vector<2x4x16x16xf32>
    %c0_11 = arith.constant 0 : index
    %c0_12 = arith.constant 0 : index
    %c0_13 = arith.constant 0 : index
    %c0_14 = arith.constant 0 : index
    %5 = vector.load %arg3[%c0_11, %c0_12, %c0_13, %c0_14] : memref<2x4x16x16xf32, #tpu.memory_space<vmem>>, vector<2x4x16x16xf32>
    tpu.vector_store %arg3[%c0_11, %c0_12, %c0_13, %c0_14], %4 {strides = array<i32>} : memref<2x4x16x16xf32, #tpu.memory_space<vmem>>, vector<2x4x16x16xf32>,
    return
  }
}

</mosaic_0001>

<bundles_post_ra>
// kernel: tpu_custom_call.1
= control target key start
LH: loop header
LB: loop body
LE: loop exit
PB: predicated region body
PF: predicated region fallthrough
CT: control target
= control target key end

     0   :  { %8 = vsyncpa [#allocation3], 0  ;;  %s380_s0 = inlined_call_operand.hbm [shape: f32[2,4,16,16], index: 0, kind: input, shape index: {}]   ;;  %s381_s1 = inlined_call_operand.hbm [shape: f32[2,4,16,16], index: 1, kind: input, shape index: {}]   ;;  %s382_s2 = inlined_call_operand.hbm [shape: f32[2,4,16,16], index: 2, kind: input, shape index: {}]   ;;  %s383_s3 = inlined_call_operand.hbm [shape: f32[2,4,16,16], index: 3, kind: output, shape index: {}]  }
   0x1   :  { %9 = vsyncpa [#allocation6], 0 }
   0x2   :  { %10 = vsyncpa [#allocation4], 0  ;;  %s271_s12 = smov [#allocation5]   ;;  %s272_s14 = smov [#allocation2]  }
   0x3   :  { %s28_s13 = sshll.u32 %s271_s12, 4  ;;  %s16_s15 = sshll.u32 %s272_s14, 4  ;;  %s29_s13 = int_to_ptr.vmem [resolvable:$true] %s28_s13  ;;  %s297_s15 = int_to_ptr.vmem [resolvable:$true] %s16_s15 }
   0x4   :  { %s177_s18 = scalar_lea.hbm %s381_s1, 2048 }
   0x5   :  { %p178_p0 = scmp.ne.s32.totalorder %s381_s1, %s177_s18  ;;  %p181_p1 = scmp.lt.u32.totalorder %s177_s18, %s381_s1 }
   0x7   :  { %p183_p2 = pnand %p181_p1, %p178_p0 }
   0x9   :  { %186 = shalt.err (!%p183_p2)
}
   0xa   :  { %s187_s23 = scalar_lea.vmem %s29_s13, 2048  ;;  %p192_p4 = scmp.lt.s32.totalorder %s29_s13, %s29_s13 }
   0xb   :  { %p188_p3 = scmp.ne.s32.totalorder %s29_s13, %s187_s23  ;;  %p193_p5 = scmp.lt.s32.totalorder %s187_s23, %s187_s23 }
   0xd   :  { %p194_p6 = por %p193_p5, %p192_p4 }
   0xf   :  { %p195_p7 = pnand %p194_p6, %p188_p3 }
  0x11   :  { %198 = shalt.err (!%p195_p7)
}
  0x12   :  { %s273_s24 = smov 128   ;;  %s274_s25 = smov 8  }
  0x13   :  { %34 = dma.hbm_to_vmem [thread:$0]  %s381_s1, 2048, %s29_s13, [#allocation6], %s273_s24, %s273_s24, %s274_s25  }
  0x14   :  { %s199_s30 = scalar_lea.hbm %s380_s0, 2048 }
  0x15   :  { %p200_p8 = scmp.ne.s32.totalorder %s380_s0, %s199_s30  ;;  %p203_p9 = scmp.lt.u32.totalorder %s199_s30, %s380_s0 }
  0x17   :  { %p205_p10 = pnand %p203_p9, %p200_p8 }
  0x19   :  { %208 = shalt.err (!%p205_p10)
}
  0x1a   :  { %s209_s8 = scalar_lea.vmem %s297_s15, 2048  ;;  %p214_p12 = scmp.lt.s32.totalorder %s297_s15, %s297_s15 }
  0x1b   :  { %p210_p11 = scmp.ne.s32.totalorder %s297_s15, %s209_s8  ;;  %p215_p13 = scmp.lt.s32.totalorder %s209_s8, %s209_s8 }
  0x1d   :  { %p216_p0 = por %p215_p13, %p214_p12 }
  0x1f   :  { %p217_p1 = pnand %p216_p0, %p210_p11 }
  0x21   :  { %220 = shalt.err (!%p217_p1)
}
  0x22   :  { %22 = dma.hbm_to_vmem [thread:$0]  %s380_s0, 2048, %s297_s15, [#allocation3], %s273_s24, %s273_s24, %s274_s25  }
  0x23   :  { %s275_s10 = smov [#allocation7]   ;;  %s221_s14 = scalar_lea.hbm %s382_s2, 2048 }
  0x24   :  { %s40_s11 = sshll.u32 %s275_s10, 4  ;;  %p222_p2 = scmp.ne.s32.totalorder %s382_s2, %s221_s14  ;;  %s41_s11 = int_to_ptr.vmem [resolvable:$true] %s40_s11 }
  0x25   :  { %p225_p3 = scmp.lt.u32.totalorder %s221_s14, %s382_s2 }
  0x27   :  { %p227_p4 = pnand %p225_p3, %p222_p2 }
  0x29   :  { %230 = shalt.err (!%p227_p4)
}
  0x2a   :  { %s231_s20 = scalar_lea.vmem %s41_s11, 2048  ;;  %p236_p6 = scmp.lt.s32.totalorder %s41_s11, %s41_s11 }
  0x2b   :  { %p232_p5 = scmp.ne.s32.totalorder %s41_s11, %s231_s20  ;;  %p237_p7 = scmp.lt.s32.totalorder %s231_s20, %s231_s20 }
  0x2d   :  { %p238_p8 = por %p237_p7, %p236_p6 }
  0x2f   :  { %p239_p9 = pnand %p238_p8, %p232_p5 }
  0x31   :  { %242 = shalt.err (!%p239_p9)
}
  0x32   :  { %46 = dma.hbm_to_vmem [thread:$0]  %s382_s2, 2048, %s41_s11, [#allocation6], %s273_s24, %s273_s24, %s274_s25  }
  0x33   :  { %265 = dma.done.wait [#allocation3], 2048  }
  0x34   :  { %266 = vsyncadd [#allocation3], 4294965248 }
  0x35   :  { %267 = dma.done.wait [#allocation6], 4096  }
  0x36   :  { %268 = vsyncadd [#allocation6], 4294963200  ;;  %v56_v0 = vld [vmem:[#allocation2] sm:$0xff]  ;;  %v57_v4 = vld [vmem:[#allocation2 + $0x8] sm:$0xff]  ;;  %vm136_vm0 = vcmask 130048   ;;  %s276_s2 = smov [#allocation8]  }
  0x37   :  { %v72_v1 = vld [vmem:[#allocation5] sm:$0xff]  ;;  %v73_v5 = vld [vmem:[#allocation5 + $0x8] sm:$0xff]  ;;  %v58_v8 = vld [vmem:[#allocation2 + $0x10] sm:$0xff]  ;;  %s158_s21 = sshll.u32 %s276_s2, 4  ;;  %s159_s21 = int_to_ptr.vmem [resolvable:$true] %s158_s21 }
  0x38   :  { %v104_v2 = vld [vmem:[#allocation7] sm:$0xff]  ;;  %v88_v3 = vmul.f32 %v72_v1, %v56_v0  ;;  %v105_v6 = vld [vmem:[#allocation7 + $0x8] sm:$0xff]  ;;  %v89_v7 = vmul.f32 %v73_v5, %v57_v4  ;;  %v74_v9 = vld [vmem:[#allocation5 + $0x10] sm:$0xff]  ;;  %s243_s22 = scalar_lea.vmem %s159_s21, 2048  ;;  %p248_p11 = scmp.lt.s32.totalorder %s159_s21, %s159_s21 }
  0x39   :  { %v106_v10 = vld [vmem:[#allocation7 + $0x10] sm:$0xff]  ;;  %v90_v12 = vmul.f32 %v74_v9, %v58_v8  ;;  %v59_v13 = vld [vmem:[#allocation2 + $0x18] sm:$0xff]  ;;  %v60_v18 = vld [vmem:[#allocation2 + $0x20] sm:$0xff]  ;;  %p244_p10 = scmp.ne.s32.totalorder %s159_s21, %s243_s22  ;;  %p249_p12 = scmp.lt.s32.totalorder %s243_s22, %s243_s22 }
  0x3a   :  { %v120_v11 = vmul.f32 %v104_v2, %v88_v3  ;;  %v75_v14 = vld [vmem:[#allocation5 + $0x18] sm:$0xff]  ;;  %v121_v16 = vmul.f32 %v105_v6, %v89_v7  ;;  %v76_v19 = vld [vmem:[#allocation5 + $0x20] sm:$0xff]  ;;  %v61_v23 = vld [vmem:[#allocation2 + $0x28] sm:$0xff] }
  0x3b   :  { %v107_v15 = vld [vmem:[#allocation7 + $0x18] sm:$0xff]  ;;  %v91_v17 = vmul.f32 %v75_v14, %v59_v13  ;;  %v108_v20 = vld [vmem:[#allocation7 + $0x20] sm:$0xff]  ;;  %v122_v21 = vmul.f32 %v106_v10, %v90_v12  ;;  %v92_v22 = vmul.f32 %v76_v19, %v60_v18  ;;  %v77_v24 = vld [vmem:[#allocation5 + $0x28] sm:$0xff]  ;;  %p250_p13 = por %p249_p12, %p248_p11 }
  0x3c   :  { %137 = vst.msk [vmem:[#allocation8] sm:$0xff] %vm136_vm0, %v120_v11  ;;  %v109_v25 = vld [vmem:[#allocation7 + $0x28] sm:$0xff]  ;;  %138 = vst.msk [vmem:[#allocation8 + $0x8] sm:$0xff] %vm136_vm0, %v121_v16  ;;  %v93_v27 = vmul.f32 %v77_v24, %v61_v23  ;;  %v62_v28 = vld [vmem:[#allocation2 + $0x30] sm:$0xff] }
  0x3d   :  { %v123_v26 = vmul.f32 %v107_v15, %v91_v17  ;;  %v78_v29 = vld [vmem:[#allocation5 + $0x30] sm:$0xff]  ;;  %139 = vst.msk [vmem:[#allocation8 + $0x10] sm:$0xff] %vm136_vm0, %v122_v21  ;;  %v124_v31 = vmul.f32 %v108_v20, %v92_v22  ;;  %v63_v33 = vld [vmem:[#allocation2 + $0x38] sm:$0xff]  ;;  %v64_v38 = vld [vmem:[#allocation2 + $0x40] sm:$0xff]  ;;  %p251_p0 = pnand %p250_p13, %p244_p10 }
  0x3e   :  { %v110_v30 = vld [vmem:[#allocation7 + $0x30] sm:$0xff]  ;;  %v94_v32 = vmul.f32 %v78_v29, %v62_v28  ;;  %v79_v34 = vld [vmem:[#allocation5 + $0x38] sm:$0xff]  ;;  %v125_v36 = vmul.f32 %v109_v25, %v93_v27  ;;  %v80_v39 = vld [vmem:[#allocation5 + $0x40] sm:$0xff] }
  0x3f   :  { %v111_v35 = vld [vmem:[#allocation7 + $0x38] sm:$0xff]  ;;  %140 = vst.msk [vmem:[#allocation8 + $0x18] sm:$0xff] %vm136_vm0, %v123_v26  ;;  %v95_v37 = vmul.f32 %v79_v34, %v63_v33  ;;  %v112_v40 = vld [vmem:[#allocation7 + $0x40] sm:$0xff]  ;;  %141 = vst.msk [vmem:[#allocation8 + $0x20] sm:$0xff] %vm136_vm0, %v124_v31  ;;  %v96_v42 = vmul.f32 %v80_v39, %v64_v38 }
  0x40   :  { %v126_v41 = vmul.f32 %v110_v30, %v94_v32  ;;  %v65_v43 = vld [vmem:[#allocation2 + $0x48] sm:$0xff]  ;;  %142 = vst.msk [vmem:[#allocation8 + $0x28] sm:$0xff] %vm136_vm0, %v125_v36  ;;  %v66_v48 = vld [vmem:[#allocation2 + $0x50] sm:$0xff]  ;;  %v67_v53 = vld [vmem:[#allocation2 + $0x58] sm:$0xff] }
  0x41   :  { %v81_v44 = vld [vmem:[#allocation5 + $0x48] sm:$0xff]  ;;  %v127_v46 = vmul.f32 %v111_v35, %v95_v37  ;;  %v82_v49 = vld [vmem:[#allocation5 + $0x50] sm:$0xff]  ;;  %v128_v51 = vmul.f32 %v112_v40, %v96_v42  ;;  %v83_v54 = vld [vmem:[#allocation5 + $0x58] sm:$0xff] }
  0x42   :  { %v113_v45 = vld [vmem:[#allocation7 + $0x48] sm:$0xff]  ;;  %v97_v47 = vmul.f32 %v81_v44, %v65_v43  ;;  %v114_v50 = vld [vmem:[#allocation7 + $0x50] sm:$0xff]  ;;  %143 = vst.msk [vmem:[#allocation8 + $0x30] sm:$0xff] %vm136_vm0, %v126_v41  ;;  %v98_v52 = vmul.f32 %v82_v49, %v66_v48  ;;  %v115_v55 = vld [vmem:[#allocation7 + $0x58] sm:$0xff]  ;;  %v99_v57 = vmul.f32 %v83_v54, %v67_v53 }
  0x43   :  { %144 = vst.msk [vmem:[#allocation8 + $0x38] sm:$0xff] %vm136_vm0, %v127_v46  ;;  %v68_v58 = vld [vmem:[#allocation2 + $0x60] sm:$0xff]  ;;  %145 = vst.msk [vmem:[#allocation8 + $0x40] sm:$0xff] %vm136_vm0, %v128_v51  ;;  %v69_v63 = vld [vmem:[#allocation2 + $0x68] sm:$0xff] }
  0x44   :  { %v129_v56 = vmul.f32 %v113_v45, %v97_v47  ;;  %v84_v59 = vld [vmem:[#allocation5 + $0x60] sm:$0xff]  ;;  %v130_v61 = vmul.f32 %v114_v50, %v98_v52  ;;  %v85_v0 = vld [vmem:[#allocation5 + $0x68] sm:$0xff]  ;;  %v131_v2 = vmul.f32 %v115_v55, %v99_v57  ;;  %v70_v4 = vld [vmem:[#allocation2 + $0x70] sm:$0xff] }
  0x45   :  { %v116_v60 = vld [vmem:[#allocation7 + $0x60] sm:$0xff]  ;;  %v100_v62 = vmul.f32 %v84_v59, %v68_v58  ;;  %v117_v1 = vld [vmem:[#allocation7 + $0x68] sm:$0xff]  ;;  %v101_v3 = vmul.f32 %v85_v0, %v69_v63  ;;  %v86_v5 = vld [vmem:[#allocation5 + $0x70] sm:$0xff] }
  0x46   :  { %146 = vst.msk [vmem:[#allocation8 + $0x48] sm:$0xff] %vm136_vm0, %v129_v56  ;;  %v118_v6 = vld [vmem:[#allocation7 + $0x70] sm:$0xff]  ;;  %147 = vst.msk [vmem:[#allocation8 + $0x50] sm:$0xff] %vm136_vm0, %v130_v61  ;;  %v102_v8 = vmul.f32 %v86_v5, %v70_v4  ;;  %v71_v9 = vld [vmem:[#allocation2 + $0x78] sm:$0xff] }
  0x47   :  { %v132_v7 = vmul.f32 %v116_v60, %v100_v62  ;;  %v87_v10 = vld [vmem:[#allocation5 + $0x78] sm:$0xff]  ;;  %148 = vst.msk [vmem:[#allocation8 + $0x58] sm:$0xff] %vm136_vm0, %v131_v2  ;;  %v133_v12 = vmul.f32 %v117_v1, %v101_v3 }
  0x48   :  { %v119_v11 = vld [vmem:[#allocation7 + $0x78] sm:$0xff]  ;;  %v103_v13 = vmul.f32 %v87_v10, %v71_v9  ;;  %v134_v14 = vmul.f32 %v118_v6, %v102_v8 }
  0x49   :  { %149 = vst.msk [vmem:[#allocation8 + $0x60] sm:$0xff] %vm136_vm0, %v132_v7  ;;  %150 = vst.msk [vmem:[#allocation8 + $0x68] sm:$0xff] %vm136_vm0, %v133_v12 }
  0x4a   :  { %v135_v15 = vmul.f32 %v119_v11, %v103_v13  ;;  %151 = vst.msk [vmem:[#allocation8 + $0x70] sm:$0xff] %vm136_vm0, %v134_v14 }
  0x4c   :  { %152 = vst.msk [vmem:[#allocation8 + $0x78] sm:$0xff] %vm136_vm0, %v135_v15 }
  0x4d   :  { %254 = shalt.err (!%p251_p0)
}
  0x4e   :  { %s255_s27 = scalar_lea.hbm %s383_s3, 2048 }
  0x4f   :  { %p256_p1 = scmp.ne.s32.totalorder %s383_s3, %s255_s27  ;;  %p259_p2 = scmp.lt.u32.totalorder %s255_s27, %s383_s3 }
  0x51   :  { %p261_p3 = pnand %p259_p2, %p256_p1 }
  0x53   :  { %264 = shalt.err (!%p261_p3)
}
  0x54   :  { %164 = dma.vmem_to_hbm [thread:$0]  %s159_s21, 2048, %s383_s3, [#allocation4], %s273_s24, %s273_s24, %s274_s25  }
  0x55   :  { %269 = dma.done.wait [#allocation4], 2048  }
  0x56   :  { %270 = vsyncadd [#allocation4], 4294965248 }
  0x57   :  { %168 = vsyncpa [#allocation3], 1 }
  0x58   :  { %169 = vsyncpa [#allocation6], 1 }
  0x59   :  { %170 = vsyncpa [#allocation4], 1 }

</bundles_post_ra>
